<compile_context>
chip_gen: v7x
topology: tpu7x:2x2x1
jax: 0.10.0
libtpu: 0.0.40
codegen_flags: <defaults>
</compile_context>

<pallas_src>
import functools

import jax
import jax.numpy as jnp
from jax.experimental import pallas as pl
from jax.experimental.pallas import tpu as pltpu

LANE = 128


def round_up(x, m):
    return ((x + m - 1) // m) * m


# ----------------------------- Pallas kernel --------------------------------
def _sage_conv_kernel(adj_ref, xk_ref, xi_ref, wcat_ref, b_ref, out_ref,
                      acc_ref, h_ref, *, e_pad):
    k = pl.program_id(1)

    @pl.when(k == 0)
    def _init():
        acc_ref[...] = jnp.zeros_like(acc_ref)

    # agg accumulation: bf16 x bf16 -> f32 on the MXU
    acc_ref[...] += jnp.dot(adj_ref[...], xk_ref[...],
                            preferred_element_type=jnp.float32)

    @pl.when(k == pl.num_programs(1) - 1)
    def _epilogue():
        # h = [agg | x_root]  (tm, 2*E_pad) bf16; fused projection:
        #   out = h @ [[Wl^T], [Wr^T]] + b
        h_ref[:, :e_pad] = acc_ref[...].astype(jnp.bfloat16)
        h_ref[:, e_pad:] = xi_ref[...]
        out = jnp.dot(h_ref[...], wcat_ref[...],
                      preferred_element_type=jnp.float32)
        out_ref[...] = out + b_ref[...]


# ------------------------------ tiling policy --------------------------------
def _tile_target():
    # v5e/v6e: 128 MiB VMEM -> bigger tiles; v7x: 64 MiB -> smaller tiles.
    try:
        vmem_bytes = pltpu.get_tpu_info().vmem_capacity_bytes
    except Exception:
        vmem_bytes = 64 * 1024 * 1024
    return 1024 if vmem_bytes >= 100 * 1024 * 1024 else 512


def _tiling(n):
    target = _tile_target()
    if n <= target:
        n_pad = round_up(n, 8)
        tm = tk = n_pad          # single block per axis; output stays lane-dense
    else:
        n_pad = round_up(n, target)
        tm = tk = target         # 512/1024: divisible by (8, 128)
    return n_pad, tm, tk


# ------------------------------- wrapper -------------------------------------
def sage_conv_pallas(adj_b, x_b, w_cat, bias, *, tm, tk):
    """One SAGEConv layer.

    adj_b : (N_pad, N_pad) bf16   row-normalized adjacency
    x_b   : (N_pad, E_pad) bf16   node features
    w_cat : (2*E_pad, E_pad) bf16  [[Wl^T], [Wr^T]]  (padded cols are zero)
    bias  : (1, E_pad) f32
    returns (N_pad, E_pad) f32
    """
    n_pad = adj_b.shape[0]
    e_pad = x_b.shape[1]
    grid = (n_pad // tm, n_pad // tk)

    kernel = functools.partial(_sage_conv_kernel, e_pad=e_pad)

    cost = pl.CostEstimate(
        flops=2 * n_pad * n_pad * e_pad + 2 * n_pad * (2 * e_pad) * e_pad,
        transcendentals=0,
        bytes_accessed=(2 * n_pad * n_pad            # adj (bf16)
                        + 2 * 2 * n_pad * e_pad      # x read twice (bf16)
                        + 2 * 2 * e_pad * e_pad      # W_cat (bf16)
                        + 4 * e_pad                  # bias (f32)
                        + 4 * n_pad * e_pad),        # out (f32)
    )

    return pl.pallas_call(
        kernel,
        out_shape=jax.ShapeDtypeStruct((n_pad, e_pad), jnp.float32),
        grid_spec=pltpu.PrefetchScalarGridSpec(
            num_scalar_prefetch=0,
            grid=grid,
            in_specs=[
                pl.BlockSpec((tm, tk), lambda i, k: (i, k)),            # adj tile
                pl.BlockSpec((tk, e_pad), lambda i, k: (k, 0)),         # x contraction tile
                pl.BlockSpec((tm, e_pad), lambda i, k: (i, 0)),         # x root-row tile
                pl.BlockSpec((2 * e_pad, e_pad), lambda i, k: (0, 0)),  # W_cat
                pl.BlockSpec((1, e_pad), lambda i, k: (0, 0)),          # bias
            ],
            out_specs=pl.BlockSpec((tm, e_pad), lambda i, k: (i, 0)),
            scratch_shapes=[
                pltpu.VMEM((tm, e_pad), jnp.float32),       # agg accumulator
                pltpu.VMEM((tm, 2 * e_pad), jnp.bfloat16),  # fused [agg | x] buffer
            ],
        ),
        compiler_params=pltpu.CompilerParams(
            dimension_semantics=("parallel", "arbitrary"),
            vmem_limit_bytes=32 * 1024 * 1024,
        ),
        cost_estimate=cost,
    )(adj_b, x_b, x_b, w_cat, bias)


# -------------------------------- JAX glue -----------------------------------
def build_mean_adj(edge_index, num_nodes):
    """Row-normalized dense adjacency: adj[i, j] = 1/deg_in(i) if edge j->i."""
    src = edge_index[0]
    dst = edge_index[1]
    adj = jnp.zeros((num_nodes, num_nodes), jnp.float32)
    adj = adj.at[dst, src].add(1.0)
    deg = jnp.sum(adj, axis=1, keepdims=True)
    return adj / jnp.maximum(deg, 1.0)


def xavier_uniform(key, shape):
    fan_in, fan_out = shape[1], shape[0]
    bound = jnp.sqrt(6.0 / (fan_in + fan_out))
    return jax.random.uniform(key, shape, jnp.float32, -bound, bound)


class GCLModelPallas:
    def __init__(self, num_users, num_items, emb_size=64, num_layers=1, seed=0):
        self.num_users = num_users
        self.num_items = num_items
        self.emb_size = emb_size
        self.emb_pad = round_up(emb_size, LANE)

        key = jax.random.PRNGKey(seed)
        k_u, k_i, *k_layers = jax.random.split(key, 2 + 3 * num_layers)
        # nn.init.xavier_uniform_ on embedding weights
        self.user_emb = xavier_uniform(k_u, (num_users, emb_size))
        self.item_emb = xavier_uniform(k_i, (num_items, emb_size))

        e, ep = emb_size, self.emb_pad
        self.layers_ref = []      # (wl_t, wr_t, b) f32 unpadded, for references
        self.layers_kernel = []   # (W_cat bf16 (2*E_pad, E_pad), bias f32 (1, E_pad))
        for li in range(num_layers):
            kl, kr, kb = k_layers[3 * li], k_layers[3 * li + 1], k_layers[3 * li + 2]
            wl = xavier_uniform(kl, (e, e))   # lin_l.weight (aggregation path, has bias)
            wr = xavier_uniform(kr, (e, e))   # lin_r.weight (root path, no bias)
            bound = 1.0 / jnp.sqrt(jnp.float32(e))
            b = jax.random.uniform(kb, (1, e), jnp.float32, -bound, bound)
            wl_t, wr_t = wl.T, wr.T
            self.layers_ref.append((wl_t, wr_t, b))
            # zero-pad to lane width, fuse [Wl^T ; Wr^T] along contraction dim
            wl_p = jnp.zeros((ep, ep), jnp.float32).at[:e, :e].set(wl_t)
            wr_p = jnp.zeros((ep, ep), jnp.float32).at[:e, :e].set(wr_t)
            w_cat = jnp.concatenate([wl_p, wr_p], axis=0).astype(jnp.bfloat16)
            b_p = jnp.zeros((1, ep), jnp.float32).at[:, :e].set(b)
            self.layers_kernel.append((w_cat, b_p))

    def __call__(self, edge_index):
        n = self.num_users + self.num_items
        n_pad, tm, tk = _tiling(n)
        e, ep = self.emb_size, self.emb_pad

        x = jnp.concatenate([self.user_emb, self.item_emb], axis=0)    # (N, E)
        x = jnp.pad(x, ((0, n_pad - n), (0, ep - e)))                  # (N_pad, E_pad)

        adj = build_mean_adj(edge_index, n)
        adj = jnp.pad(adj, ((0, n_pad - n), (0, n_pad - n)))
        adj_b = adj.astype(jnp.bfloat16)

        for w_cat, b_p in self.layers_kernel:
            x = sage_conv_pallas(adj_b, x.astype(jnp.bfloat16), w_cat, b_p,
                                 tm=tm, tk=tk)                         # f32 out

        x = x[:n, :e]
        return x[:self.num_users], x[self.num_users:]


# ------------------------------ pure-JAX refs ---------------------------------
def reference_forward_matched(model, edge_index):
    """Reference with the kernel's numerics (bf16 inputs, f32 accumulation)."""
    n = model.num_users + model.num_items
    x = jnp.concatenate([model.user_emb, model.item_emb], axis=0)
    adj_b = build_mean_adj(edge_index, n).astype(jnp.bfloat16)
    for wl_t, wr_t, b in model.layers_ref:
        x_b = x.astype(jnp.bfloat16)
        agg = jnp.dot(adj_b, x_b, preferred_element_type=jnp.float32)
        h = jnp.concatenate([agg.astype(jnp.bfloat16), x_b], axis=-1)
        w_cat = jnp.concatenate([wl_t, wr_t], axis=0).astype(jnp.bfloat16)
        x = jnp.dot(h, w_cat, preferred_element_type=jnp.float32) + b
    return x[:model.num_users], x[model.num_users:]


def reference_forward_f32(model, edge_index):
    """Full-precision reference (exact PyG SAGEConv semantics)."""
    n = model.num_users + model.num_items
    x = jnp.concatenate([model.user_emb, model.item_emb], axis=0)
    adj = build_mean_adj(edge_index, n)
    for wl_t, wr_t, b in model.layers_ref:
        agg = adj @ x
        x = agg @ wl_t + x @ wr_t + b
    return x[:model.num_users], x[model.num_users:]


# ---------------------------------- main --------------------------------------
if __name__ == "__main__":
    num_users, num_items, emb_size = 8, 8, 32
    n_edges = 40

    # deterministic bipartite edge_index: user <-> item edges (both directions)
    key = jax.random.PRNGKey(0)
    ku, ki = jax.random.split(key)
    users = jax.random.randint(ku, (n_edges,), 0, num_users)
    items = jax.random.randint(ki, (n_edges,), 0, num_items) + num_users
    src = jnp.concatenate([users, items])
    dst = jnp.concatenate([items, users])
    edge_index = jnp.stack([src, dst], axis=0).astype(jnp.int32)   # (2, 2*n_edges)

    for num_layers in (1, 2):
        model = GCLModelPallas(num_users, num_items, emb_size, num_layers, seed=0)
        user_out, item_out = model(edge_index)
        jax.block_until_ready(user_out)
        jax.block_until_ready(item_out)

        assert user_out.shape == (num_users, emb_size)
        assert item_out.shape == (num_items, emb_size)

        # tight check against a numerics-matched (bf16-input) reference
        ru, ri = reference_forward_matched(model, edge_index)
        assert jnp.allclose(user_out, ru, atol=1e-4, rtol=1e-4), num_layers
        assert jnp.allclose(item_out, ri, atol=1e-4, rtol=1e-4), num_layers

        # looser check against the exact f32 SAGEConv semantics
        fu, fi = reference_forward_f32(model, edge_index)
        assert jnp.allclose(user_out, fu, atol=5e-2, rtol=5e-2), num_layers
        assert jnp.allclose(item_out, fi, atol=5e-2, rtol=5e-2), num_layers

    print("KERNEL_OK")
</pallas_src>

<mosaic_0001>
module attributes {stable_mosaic.version = 11 : i64} {
  func.func @_sage_conv_kernel(%arg0: i32, %arg1: i32, %arg2: memref<16x16xbf16, #tpu.memory_space<vmem>>, %arg3: memref<16x128xbf16, #tpu.memory_space<vmem>>, %arg4: memref<16x128xbf16, #tpu.memory_space<vmem>>, %arg5: memref<256x128xbf16, #tpu.memory_space<vmem>>, %arg6: memref<1x128xf32, #tpu.memory_space<vmem>>, %arg7: memref<16x128xf32, #tpu.memory_space<vmem>>, %arg8: memref<16x128xf32, #tpu.memory_space<vmem>>, %arg9: memref<16x256xbf16, #tpu.memory_space<vmem>>) attributes {dimension_semantics = [#tpu.dimension_semantics<parallel>, #tpu.dimension_semantics<arbitrary>], iteration_bounds = array<i64: 1, 1>, scalar_prefetch = 0 : i64, scratch_operands = 2 : i64, tpu.core_type = #tpu.core_type<tc>, window_params = [{transform_indices = @transform_0, window_bounds = array<i64: 16, 16>}, {transform_indices = @transform_1, window_bounds = array<i64: 16, 128>}, {transform_indices = @transform_2, window_bounds = array<i64: 16, 128>}, {pipeline_mode = #tpu.pipeline_mode<synchronous>, transform_indices = @transform_3, window_bounds = array<i64: 256, 128>}, {pipeline_mode = #tpu.pipeline_mode<synchronous>, transform_indices = @transform_4, window_bounds = array<i64: 1, 128>}, {transform_indices = @transform_5, window_bounds = array<i64: 16, 128>}]} {
    %c0_i32 = arith.constant 0 : i32
    %0 = arith.cmpi eq, %arg1, %c0_i32 : i32
    %1 = arith.extui %0 : i1 to i32
    %c0_i32_0 = arith.constant 0 : i32
    %2 = arith.cmpi ne, %1, %c0_i32_0 : i32
    scf.if %2 {
      %cst_10 = arith.constant 0.000000e+00 : f32
      %12 = vector.broadcast %cst_10 : f32 to vector<16x128xf32>
      %c0_11 = arith.constant 0 : index
      %c0_12 = arith.constant 0 : index
      %13 = vector.load %arg8[%c0_11, %c0_12] : memref<16x128xf32, #tpu.memory_space<vmem>>, vector<16x128xf32>
      tpu.vector_store %arg8[%c0_11, %c0_12], %12 {strides = array<i32>} : memref<16x128xf32, #tpu.memory_space<vmem>>, vector<16x128xf32>,
    } else {
    }
    %c0 = arith.constant 0 : index
    %c0_1 = arith.constant 0 : index
    %3 = vector.load %arg8[%c0, %c0_1] : memref<16x128xf32, #tpu.memory_space<vmem>>, vector<16x128xf32>
    %c0_2 = arith.constant 0 : index
    %c0_3 = arith.constant 0 : index
    %4 = vector.load %arg2[%c0_2, %c0_3] : memref<16x16xbf16, #tpu.memory_space<vmem>>, vector<16x16xbf16>
    %c0_4 = arith.constant 0 : index
    %c0_5 = arith.constant 0 : index
    %5 = vector.load %arg3[%c0_4, %c0_5] : memref<16x128xbf16, #tpu.memory_space<vmem>>, vector<16x128xbf16>
    %cst = arith.constant dense<0.000000e+00> : vector<16x128xf32>
    %6 = tpu.matmul %4, %5, %cst {dimension_numbers = #tpu.dot_dimension_numbers<[1], [0], [0], [1], [0, 0, 1, 1], [], []>} : vector<16x16xbf16>, vector<16x128xbf16>, vector<16x128xf32> -> vector<16x128xf32>
    %7 = arith.addf %3, %6 : vector<16x128xf32>
    %c0_6 = arith.constant 0 : index
    %c0_7 = arith.constant 0 : index
    %8 = vector.load %arg8[%c0_6, %c0_7] : memref<16x128xf32, #tpu.memory_space<vmem>>, vector<16x128xf32>
    tpu.vector_store %arg8[%c0_6, %c0_7], %7 {strides = array<i32>} : memref<16x128xf32, #tpu.memory_space<vmem>>, vector<16x128xf32>,
    %c0_i32_8 = arith.constant 0 : i32
    %9 = arith.cmpi eq, %arg1, %c0_i32_8 : i32
    %10 = arith.extui %9 : i1 to i32
    %c0_i32_9 = arith.constant 0 : i32
    %11 = arith.cmpi ne, %10, %c0_i32_9 : i32
    scf.if %11 {
      %c0_10 = arith.constant 0 : index
      %c0_11 = arith.constant 0 : index
      %12 = vector.load %arg8[%c0_10, %c0_11] : memref<16x128xf32, #tpu.memory_space<vmem>>, vector<16x128xf32>
      %13 = arith.truncf %12 : vector<16x128xf32> to vector<16x128xbf16>
      %c0_12 = arith.constant 0 : index
      %c0_13 = arith.constant 0 : index
      %14 = vector.load %arg9[%c0_12, %c0_13] : memref<16x256xbf16, #tpu.memory_space<vmem>>, vector<16x128xbf16>
      tpu.vector_store %arg9[%c0_12, %c0_13], %13 {strides = array<i32>} : memref<16x256xbf16, #tpu.memory_space<vmem>>, vector<16x128xbf16>,
      %c0_14 = arith.constant 0 : index
      %c0_15 = arith.constant 0 : index
      %15 = vector.load %arg4[%c0_14, %c0_15] : memref<16x128xbf16, #tpu.memory_space<vmem>>, vector<16x128xbf16>
      %c0_16 = arith.constant 0 : index
      %c128 = arith.constant 128 : index
      %16 = vector.load %arg9[%c0_16, %c128] : memref<16x256xbf16, #tpu.memory_space<vmem>>, vector<16x128xbf16>
      tpu.vector_store %arg9[%c0_16, %c128], %15 {strides = array<i32>} : memref<16x256xbf16, #tpu.memory_space<vmem>>, vector<16x128xbf16>,
      %c0_17 = arith.constant 0 : index
      %c0_18 = arith.constant 0 : index
      %17 = vector.load %arg9[%c0_17, %c0_18] : memref<16x256xbf16, #tpu.memory_space<vmem>>, vector<16x256xbf16>
      %c0_19 = arith.constant 0 : index
      %c0_20 = arith.constant 0 : index
      %18 = vector.load %arg5[%c0_19, %c0_20] : memref<256x128xbf16, #tpu.memory_space<vmem>>, vector<256x128xbf16>
      %cst_21 = arith.constant dense<0.000000e+00> : vector<16x128xf32>
      %19 = tpu.matmul %17, %18, %cst_21 {dimension_numbers = #tpu.dot_dimension_numbers<[1], [0], [0], [1], [0, 0, 1, 1], [], []>} : vector<16x256xbf16>, vector<256x128xbf16>, vector<16x128xf32> -> vector<16x128xf32>
      %c0_22 = arith.constant 0 : index
      %c0_23 = arith.constant 0 : index
      %20 = vector.load %arg6[%c0_22, %c0_23] : memref<1x128xf32, #tpu.memory_space<vmem>>, vector<1x128xf32>
      %21 = vector.broadcast %20 : vector<1x128xf32> to vector<16x128xf32>
      %22 = arith.addf %19, %21 : vector<16x128xf32>
      %c0_24 = arith.constant 0 : index
      %c0_25 = arith.constant 0 : index
      %23 = vector.load %arg7[%c0_24, %c0_25] : memref<16x128xf32, #tpu.memory_space<vmem>>, vector<16x128xf32>
      tpu.vector_store %arg7[%c0_24, %c0_25], %22 {strides = array<i32>} : memref<16x128xf32, #tpu.memory_space<vmem>>, vector<16x128xf32>,
    } else {
    }
    return
  }
  func.func @transform_0(%arg0: i32, %arg1: i32) -> (i32, i32) {
    %c0_i32 = arith.constant 0 : i32
    return %arg0, %arg1 : i32, i32
  }
  func.func @transform_1(%arg0: i32, %arg1: i32) -> (i32, i32) {
    %c0_i32 = arith.constant 0 : i32
    %c0_i32_0 = arith.constant 0 : i32
    return %arg1, %c0_i32 : i32, i32
  }
  func.func @transform_2(%arg0: i32, %arg1: i32) -> (i32, i32) {
    %c0_i32 = arith.constant 0 : i32
    %c0_i32_0 = arith.constant 0 : i32
    return %arg0, %c0_i32 : i32, i32
  }
  func.func @transform_3(%arg0: i32, %arg1: i32) -> (i32, i32) {
    %c0_i32 = arith.constant 0 : i32
    %c0_i32_0 = arith.constant 0 : i32
    %c0_i32_1 = arith.constant 0 : i32
    return %c0_i32, %c0_i32_0 : i32, i32
  }
  func.func @transform_4(%arg0: i32, %arg1: i32) -> (i32, i32) {
    %c0_i32 = arith.constant 0 : i32
    %c0_i32_0 = arith.constant 0 : i32
    %c0_i32_1 = arith.constant 0 : i32
    return %c0_i32, %c0_i32_0 : i32, i32
  }
  func.func @transform_5(%arg0: i32, %arg1: i32) -> (i32, i32) {
    %c0_i32 = arith.constant 0 : i32
    %c0_i32_0 = arith.constant 0 : i32
    return %arg0, %c0_i32 : i32, i32
  }
}

</mosaic_0001>

<bundles_post_ra>
// kernel: tpu_custom_call.1
= control target key start
LH: loop header
LB: loop body
LE: loop exit
PB: predicated region body
PF: predicated region fallthrough
CT: control target
= control target key end

     0   :  { %10 = vsyncpa [#allocation5], 0  ;;  %s693_s0 = inlined_call_operand.hbm [shape: bf16[16,16], index: 0, kind: input, shape index: {}]   ;;  %s694_s1 = inlined_call_operand.hbm [shape: bf16[16,128], index: 1, kind: input, shape index: {}]   ;;  %s695_s2 = inlined_call_operand.hbm [shape: bf16[16,128], index: 2, kind: input, shape index: {}]   ;;  %s696_s3 = inlined_call_operand.hbm [shape: bf16[256,128], index: 3, kind: input, shape index: {}]   ;;  %s697_s4 = inlined_call_operand.vmem [shape: f32[1,128], index: 4, kind: input, shape index: {}]   ;;  %s698_s5 = inlined_call_operand.hbm [shape: f32[16,128], index: 5, kind: output, shape index: {}]  }
   0x1   :  { %11 = vsyncpa [#allocation8], 0 }
   0x2   :  { %12 = vsyncpa [#allocation11], 0 }
   0x3   :  { %13 = vsyncpa [#allocation6], 0  ;;  %s563_s18 = smov [#allocation7]   ;;  %s564_s20 = smov [#allocation4]  }
   0x4   :  { %s31_s19 = sshll.u32 %s563_s18, 4  ;;  %s19_s21 = sshll.u32 %s564_s20, 4  ;;  %s32_s19 = int_to_ptr.vmem [resolvable:$true] %s31_s19  ;;  %s604_s21 = int_to_ptr.vmem [resolvable:$true] %s19_s21 }
   0x5   :  { %s445_s24 = scalar_lea.hbm %s694_s1, 128 }
   0x6   :  { %p446_p0 = scmp.ne.s32.totalorder %s694_s1, %s445_s24  ;;  %p449_p1 = scmp.lt.u32.totalorder %s445_s24, %s694_s1 }
   0x8   :  { %p451_p2 = pnand %p449_p1, %p446_p0 }
   0xa   :  { %454 = shalt.err (!%p451_p2)
}
   0xb   :  { %s455_s29 = scalar_lea.vmem %s32_s19, 128  ;;  %p460_p4 = scmp.lt.s32.totalorder %s32_s19, %s32_s19 }
   0xc   :  { %p456_p3 = scmp.ne.s32.totalorder %s32_s19, %s455_s29  ;;  %p461_p5 = scmp.lt.s32.totalorder %s455_s29, %s455_s29 }
   0xe   :  { %p462_p6 = por %p461_p5, %p460_p4 }
  0x10   :  { %p463_p7 = pnand %p462_p6, %p456_p3 }
  0x12   :  { %466 = shalt.err (!%p463_p7)
}
  0x13   :  { %s565_s30 = smov 64   ;;  %s566_s6 = smov 4  }
  0x14   :  { %37 = dma.hbm_to_vmem [thread:$0]  %s694_s1, 128, %s32_s19, [#allocation8], %s565_s30, %s565_s30, %s566_s6  }
  0x15   :  { %s467_s11 = scalar_lea.hbm %s693_s0, 128 }
  0x16   :  { %p468_p8 = scmp.ne.s32.totalorder %s693_s0, %s467_s11  ;;  %p471_p9 = scmp.lt.u32.totalorder %s467_s11, %s693_s0 }
  0x18   :  { %p473_p10 = pnand %p471_p9, %p468_p8 }
  0x1a   :  { %476 = shalt.err (!%p473_p10)
}
  0x1b   :  { %s477_s16 = scalar_lea.vmem %s604_s21, 128  ;;  %p482_p12 = scmp.lt.s32.totalorder %s604_s21, %s604_s21 }
  0x1c   :  { %p478_p11 = scmp.ne.s32.totalorder %s604_s21, %s477_s16  ;;  %p483_p13 = scmp.lt.s32.totalorder %s477_s16, %s477_s16 }
  0x1e   :  { %p484_p0 = por %p483_p13, %p482_p12 }
  0x20   :  { %p485_p1 = pnand %p484_p0, %p478_p11 }
  0x22   :  { %488 = shalt.err (!%p485_p1)
}
  0x23   :  { %25 = dma.hbm_to_vmem [thread:$0]  %s693_s0, 128, %s604_s21, [#allocation5], %s565_s30, %s565_s30, %s566_s6  }
  0x24   :  { %s567_s18 = smov [#allocation9]   ;;  %s568_s20 = smov [#allocation10]  }
  0x25   :  { %s43_s19 = sshll.u32 %s567_s18, 4  ;;  %s55_s22 = sshll.u32 %s568_s20, 4  ;;  %s44_s19 = int_to_ptr.vmem [resolvable:$true] %s43_s19  ;;  %s641_s22 = int_to_ptr.vmem [resolvable:$true] %s55_s22 }
  0x26   :  { %s489_s25 = scalar_lea.hbm %s695_s2, 128 }
  0x27   :  { %p490_p2 = scmp.ne.s32.totalorder %s695_s2, %s489_s25  ;;  %p493_p3 = scmp.lt.u32.totalorder %s489_s25, %s695_s2 }
  0x29   :  { %p495_p4 = pnand %p493_p3, %p490_p2 }
  0x2b   :  { %498 = shalt.err (!%p495_p4)
}
  0x2c   :  { %s499_s0 = scalar_lea.vmem %s44_s19, 128  ;;  %p504_p6 = scmp.lt.s32.totalorder %s44_s19, %s44_s19 }
  0x2d   :  { %p500_p5 = scmp.ne.s32.totalorder %s44_s19, %s499_s0  ;;  %p505_p7 = scmp.lt.s32.totalorder %s499_s0, %s499_s0 }
  0x2f   :  { %p506_p8 = por %p505_p7, %p504_p6 }
  0x31   :  { %p507_p9 = pnand %p506_p8, %p500_p5 }
  0x33   :  { %510 = shalt.err (!%p507_p9)
}
  0x34   :  { %49 = dma.hbm_to_vmem [thread:$0]  %s695_s2, 128, %s44_s19, [#allocation8], %s565_s30, %s565_s30, %s566_s6  }
  0x35   :  { %s511_s10 = scalar_lea.hbm %s696_s3, 2048 }
  0x36   :  { %p512_p10 = scmp.ne.s32.totalorder %s696_s3, %s511_s10  ;;  %p515_p11 = scmp.lt.u32.totalorder %s511_s10, %s696_s3 }
  0x38   :  { %p517_p12 = pnand %p515_p11, %p512_p10 }
  0x3a   :  { %520 = shalt.err (!%p517_p12)
}
  0x3b   :  { %s521_s15 = scalar_lea.vmem %s641_s22, 2048  ;;  %p526_p0 = scmp.lt.s32.totalorder %s641_s22, %s641_s22 }
  0x3c   :  { %p522_p13 = scmp.ne.s32.totalorder %s641_s22, %s521_s15  ;;  %p527_p1 = scmp.lt.s32.totalorder %s521_s15, %s521_s15 }
  0x3e   :  { %p528_p2 = por %p527_p1, %p526_p0 }
  0x40   :  { %p529_p3 = pnand %p528_p2, %p522_p13 }
  0x42   :  { %532 = shalt.err (!%p529_p3)
}
  0x43   :  { %61 = dma.hbm_to_vmem [thread:$0]  %s696_s3, 2048, %s641_s22, [#allocation11], %s565_s30, %s565_s30, %s566_s6  }
  0x44   :  { %555 = dma.done.wait [#allocation5], 128  }
  0x45   :  { %556 = vsyncadd [#allocation5], 4294967168 }
  0x46   :  { %557 = dma.done.wait [#allocation8], 256  }
  0x47   :  { %558 = vsyncadd [#allocation8], 4294967040 }
  0x48   :  { %559 = dma.done.wait [#allocation11], 2048  }
  0x49   :  { %560 = vsyncadd [#allocation11], 4294965248  ;;  %v569_v0 = vmov 0.0   ;;  %vm570_vm0 = vmmov 0   ;;  %v426_v1 = vld [vmem:[#allocation7] sm:$0xff]   ;;  %v427_v2 = vld [vmem:[#allocation4] sm:$0xff]  }
  0x4a   :  { %409 = vmatprep.subr.bf16.mxu0 %v569_v0  ;;  %411 = vmatprep.mubr.msk.bf16.mxu0 %vm570_vm0, %v569_v0  ;;  %vm100_vm1 = vcmask 130048   ;;  %v428_v3 = vld [vmem:[#allocation10 + $0x40] sm:$0xff]   ;;  %v430_v5 = vld [vmem:[#allocation10 + $0x48] sm:$0xff]   ;;  %v432_v7 = vld [vmem:[#allocation10 + $0x50] sm:$0xff]   ;;  %s571_s6 = smov [#allocation12]  }
  0x4b   :  { %410 = vmatpush3.bf16.msra.mxu0 %v426_v1  ;;  %v429_v4 = vld [vmem:[#allocation10] sm:$0xff]   ;;  %387 = vmatprep.subr.bf16.mxu1 %v428_v3  ;;  %v431_v6 = vld [vmem:[#allocation10 + $0x8] sm:$0xff]   ;;  %v433_v8 = vld [vmem:[#allocation10 + $0x10] sm:$0xff]   ;;  %s350_s1 = sshll.u32 %s571_s6, 4  ;;  %s351_s1 = int_to_ptr.vmem [resolvable:$true] %s350_s1 }
  0x4c   :  { %388 = vmatpush3.bf16.msra.mxu1 %v429_v4  ;;  %v434_v9 = vld [vmem:[#allocation10 + $0x58] sm:$0xff]   ;;  %v436_v11 = vld [vmem:[#allocation10 + $0x60] sm:$0xff]   ;;  %v438_v13 = vld [vmem:[#allocation10 + $0x68] sm:$0xff]   ;;  %s533_s17 = scalar_lea.vmem %s351_s1, 256  ;;  %p538_p5 = scmp.lt.s32.totalorder %s351_s1, %s351_s1 }
  0x4d   :  { %389 = vmatprep.subr.bf16.mxu1 %v430_v5  ;;  %v435_v10 = vld [vmem:[#allocation10 + $0x18] sm:$0xff]   ;;  %v437_v12 = vld [vmem:[#allocation10 + $0x20] sm:$0xff]   ;;  %v439_v14 = vld [vmem:[#allocation10 + $0x28] sm:$0xff]   ;;  %p534_p4 = scmp.ne.s32.totalorder %s351_s1, %s533_s17  ;;  %p539_p6 = scmp.lt.s32.totalorder %s533_s17, %s533_s17 }
  0x4e   :  { %412 = vmatmul.mubr.msk.bf16.vlgmr.msra.gmra.mrb[0].mxu0 %vm100_vm1, %v427_v2  ;;  %v440_v15 = vld [vmem:[#allocation10 + $0x70] sm:$0xff]   ;;  %v442_v17 = vld [vmem:[#allocation10 + $0x78] sm:$0xff]   ;;  %v368_v26 = vld [vmem:[%s697_s4] ss:$0 sm:$0xff] }
  0x4f   :  { %v441_v16 = vld [vmem:[#allocation10 + $0x30] sm:$0xff]   ;;  %v443_v18 = vld [vmem:[#allocation10 + $0x38] sm:$0xff]   ;;  %p540_p7 = por %p539_p6, %p538_p5 }
  0x50   :  { %390 = vmatpush3.bf16.msra.mxu1 %v431_v6  ;;  %v444_v19 = vld [vmem:[#allocation9] sm:$0xff]  }
  0x51   :  { %391 = vmatprep.subr.bf16.mxu1 %v432_v7  ;;  %334 = vmatprep.mubr.bf16.mxu1 %v444_v19  ;;  %p541_p8 = pnand %p540_p7, %p534_p4 }
  0x54   :  { %392 = vmatpush3.bf16.msra.mxu1 %v433_v8 }
  0x55   :  { %393 = vmatprep.subr.bf16.mxu1 %v434_v9 }
  0x58   :  { %394 = vmatpush3.bf16.msra.mxu1 %v435_v10 }
  0x59   :  { %395 = vmatprep.subr.bf16.mxu1 %v436_v11 }
  0x5c   :  { %396 = vmatpush3.bf16.msra.mxu1 %v437_v12 }
  0x5d   :  { %397 = vmatprep.subr.bf16.mxu1 %v438_v13 }
  0x60   :  { %398 = vmatpush3.bf16.msra.mxu1 %v439_v14 }
  0x61   :  { %399 = vmatprep.subr.bf16.mxu1 %v440_v15 }
  0x64   :  { %400 = vmatpush3.bf16.msra.mxu1 %v441_v16 }
  0x65   :  { %401 = vmatprep.subr.bf16.mxu1 %v442_v17 }
  0x68   :  { %402 = vmatpush3.bf16.msra.mxu1 %v443_v18 }
 0x121   :  { %v138_v20 = vpop.f32.mrb[0].mxu0 }
 0x122   :  { %v413_v21 = vpop.f32.mrb[1].mxu0 }
 0x123   :  { %v141_v22 = vpop.f32.mrb[2].mxu0 }
 0x124   :  { %v154_v23 = vpack.c.bf16 %v141_v22, %v138_v20  ;;  %v414_v24 = vpop.f32.mrb[3].mxu0 }
 0x126   :  { %335 = vmatmul.mubr.bf16.vlgmr.msra.gmra.mrb[0].mxu1 %v154_v23 }
 0x1f9   :  { %v403_v25 = vpop.f32.mrb[0].mxu1 }
 0x1fa   :  { %v404_v27 = vpop.f32.mrb[1].mxu1 }
 0x1fb   :  { %v405_v28 = vadd.f32 %v404_v27, %v403_v25  ;;  %v406_v29 = vpop.f32.mrb[2].mxu1 }
 0x1fc   :  { %v407_v30 = vpop.f32.mrb[3].mxu1 }
 0x1fd   :  { %v337_v31 = vadd.f32 %v405_v28, %v368_v26  ;;  %v408_v32 = vadd.f32 %v407_v30, %v406_v29 }
 0x1ff   :  { %343 = vst [vmem:[#allocation12] sm:$0xff] %v337_v31  ;;  %v340_v33 = vadd.f32 %v408_v32, %v368_v26 }
 0x201   :  { %344 = vst [vmem:[#allocation12 + $0x8] sm:$0xff] %v340_v33 }
 0x202   :  { %544 = shalt.err (!%p541_p8)
}
 0x203   :  { %s545_s19 = scalar_lea.hbm %s698_s5, 256 }
 0x204   :  { %p546_p9 = scmp.ne.s32.totalorder %s698_s5, %s545_s19  ;;  %p549_p10 = scmp.lt.u32.totalorder %s545_s19, %s698_s5 }
 0x206   :  { %p551_p11 = pnand %p549_p10, %p546_p9 }
 0x208   :  { %554 = shalt.err (!%p551_p11)
}
 0x209   :  { %s572_s25 = smov 128   ;;  %s573_s26 = smov 8  }
 0x20a   :  { %356 = dma.vmem_to_hbm [thread:$0]  %s351_s1, 256, %s698_s5, [#allocation6], %s572_s25, %s572_s25, %s573_s26  }
 0x20b   :  { %561 = dma.done.wait [#allocation6], 256  }
 0x20c   :  { %562 = vsyncadd [#allocation6], 4294967040 }
 0x20d   :  { %360 = vsyncpa [#allocation5], 1 }
 0x20e   :  { %361 = vsyncpa [#allocation8], 1 }
 0x20f   :  { %362 = vsyncpa [#allocation11], 1 }
 0x210   :  { %363 = vsyncpa [#allocation6], 1 }

</bundles_post_ra>
